<compile_context>
chip_gen: v7x
topology: tpu7x:2x2x1
jax: 0.10.0
libtpu: 0.0.40
codegen_flags: <defaults>
</compile_context>

<pallas_src>
import functools

import jax
import jax.numpy as jnp
from jax.experimental import pallas as pl
from jax.experimental.pallas import tpu as pltpu


def _focal_loss_kernel(x_ref, t_ref, a_ref, out_ref, *, tile_c, n, gamma,
                       size_average):
    j = pl.program_id(0)

    @pl.when(j == 0)
    def _init():
        out_ref[...] = jnp.zeros_like(out_ref)

    x = x_ref[...].astype(jnp.float32)        # (N, TILE_C) logits (cast in-kernel)
    t = t_ref[...]                            # (N, 1) int32 targets
    a = a_ref[...].astype(jnp.float32)        # (1, TILE_C) alpha

    # Exact axis-0 (batch-axis) log-softmax on this C tile.  Columns are
    # independent, so tiling over C needs no cross-tile state.
    m = jnp.max(x, axis=0, keepdims=True)                         # (1, TILE_C)
    xm = x - m
    lse = jnp.log(jnp.sum(jnp.exp(xm), axis=0, keepdims=True))    # (1, TILE_C)
    log_sm = xm - lse                                             # (N, TILE_C)

    # One-hot gather at each row's (global) target column.  where-select (not
    # multiply) so garbage in a padded tail tile can never poison real rows.
    col = jax.lax.broadcasted_iota(jnp.int32, x.shape, 1) + j * tile_c
    hit = col == t                                                # (N, TILE_C)

    log_p = jnp.sum(jnp.where(hit, log_sm, 0.0), axis=1, keepdims=True)  # (N,1)
    alpha = jnp.sum(jnp.where(hit, a, 0.0), axis=1, keepdims=True)       # (N,1)
    # Rows whose target is not in this tile get log_p = 0 and alpha = 0, so
    # their contribution below is exactly 0.

    probs = jnp.exp(log_p)
    one_minus_p = 1.0 - probs

    g = float(gamma)
    if g == int(g) and g >= 0:
        gi = int(g)
        if gi == 0:
            pw = jnp.ones_like(one_minus_p)
        else:
            pw = one_minus_p
            for _ in range(gi - 1):
                pw = pw * one_minus_p
    else:
        pw = jnp.power(one_minus_p, g)

    batch_loss = -alpha * pw * log_p                               # (N, 1)
    out_ref[...] = out_ref[...] + jnp.sum(batch_loss)

    if size_average:
        @pl.when(j == pl.num_programs(0) - 1)
        def _finalize():
            out_ref[...] = out_ref[...] * (1.0 / n)


def _choose_tile_c(N, C, itemsize):
    """Pick a class-axis tile that keeps one logits buffer <= ~4 MiB."""
    budget = 4 * 1024 * 1024
    if N * C * itemsize <= budget:
        return C                      # single block over the full class axis
    if C < 128:
        # Cannot tile the lane axis below 128.
        # TODO(synk): very large N with small C needs N-tiling with an online
        # axis-0 softmax (running max/expsum carried across the N grid axis).
        return C
    tc = (budget // (N * itemsize)) // 128 * 128
    return int(max(128, min(tc, 1024)))


def focal_loss(inputs, targets, alpha=None, gamma=2.0, size_average=True,
               tile_c=None):
    """inputs: (N, C) logits (any float dtype); targets: (N,) int class ids."""
    N, C = inputs.shape
    if alpha is None:
        # torch.ones(class_num, 1) default
        alpha = jnp.ones((C,), dtype=jnp.float32)
    alpha2d = jnp.asarray(alpha, dtype=jnp.float32).reshape(1, C)
    targets2d = targets.reshape(N, 1).astype(jnp.int32)

    itemsize = jnp.dtype(inputs.dtype).itemsize
    if tile_c is None:
        tile_c = _choose_tile_c(N, C, itemsize)
    tile_c = int(tile_c)
    grid = (pl.cdiv(C, tile_c),)

    kernel = functools.partial(
        _focal_loss_kernel, tile_c=tile_c, n=N, gamma=float(gamma),
        size_average=bool(size_average))

    out = pl.pallas_call(
        kernel,
        out_shape=jax.ShapeDtypeStruct((1, 1), jnp.float32),
        grid=grid,
        in_specs=[
            pl.BlockSpec((N, tile_c), lambda j: (0, j)),   # logits tile
            pl.BlockSpec((N, 1), lambda j: (0, 0)),        # targets (resident)
            pl.BlockSpec((1, tile_c), lambda j: (0, j)),   # alpha tile
        ],
        out_specs=pl.BlockSpec((1, 1), lambda j: (0, 0)),  # resident accumulator
        compiler_params=pltpu.CompilerParams(
            dimension_semantics=("arbitrary",)),
    )(inputs, targets2d, alpha2d)
    return out[0, 0]


def _focal_loss_ref(inputs, targets, alpha, gamma, size_average):
    """Pure-JAX reference mirroring the PyTorch forward exactly."""
    x = inputs.astype(jnp.float32)
    N, C = x.shape
    p = jax.nn.softmax(x, axis=0)
    mask = jax.nn.one_hot(targets, C, dtype=jnp.float32)
    probs = jnp.sum(p * mask, axis=1, keepdims=True)
    a = jnp.asarray(alpha, dtype=jnp.float32).reshape(-1)[targets].reshape(-1, 1)
    log_p = jnp.log(probs)
    batch_loss = -a * jnp.power(1.0 - probs, gamma) * log_p
    return jnp.mean(batch_loss) if size_average else jnp.sum(batch_loss)


if __name__ == "__main__":
    key = jax.random.PRNGKey(0)
    k1, k2, k3, k4, k5, k6 = jax.random.split(key, 6)

    # Case 1: small single-tile path, integer-gamma fast path, mean reduction.
    N1, C1 = 8, 4
    x1 = jax.random.normal(k1, (N1, C1), dtype=jnp.float32)
    t1 = jax.random.randint(k2, (N1,), 0, C1, dtype=jnp.int32)
    a1 = jnp.ones((C1,), dtype=jnp.float32)
    got1 = jax.block_until_ready(
        focal_loss(x1, t1, alpha=a1, gamma=2.0, size_average=True))
    ref1 = _focal_loss_ref(x1, t1, a1, 2.0, True)
    assert jnp.allclose(got1, ref1, rtol=1e-5, atol=1e-5), (got1, ref1)

    # Case 2: bf16 logits (cast in-kernel), tiled C grid with a partial last
    # tile (320 = 2*128 + 64), per-class alpha, sum reduction.
    N2, C2 = 16, 320
    x2 = jax.random.normal(k3, (N2, C2), dtype=jnp.bfloat16)
    t2 = jax.random.randint(k4, (N2,), 0, C2, dtype=jnp.int32)
    a2 = jax.random.uniform(k5, (C2,), dtype=jnp.float32, minval=0.25, maxval=1.0)
    got2 = jax.block_until_ready(
        focal_loss(x2, t2, alpha=a2, gamma=2.0, size_average=False, tile_c=128))
    ref2 = _focal_loss_ref(x2, t2, a2, 2.0, False)
    assert jnp.allclose(got2, ref2, rtol=1e-5, atol=1e-4), (got2, ref2)

    # Case 3: non-integer gamma (jnp.power path), even multi-tile split, mean.
    N3, C3 = 16, 384
    x3 = jax.random.normal(k6, (N3, C3), dtype=jnp.float32)
    t3 = jax.random.randint(k2, (N3,), 0, C3, dtype=jnp.int32)
    a3 = jnp.ones((C3,), dtype=jnp.float32)
    got3 = jax.block_until_ready(
        focal_loss(x3, t3, alpha=a3, gamma=1.5, size_average=True, tile_c=128))
    ref3 = _focal_loss_ref(x3, t3, a3, 1.5, True)
    assert jnp.allclose(got3, ref3, rtol=1e-5, atol=1e-5), (got3, ref3)

    print("KERNEL_OK")
</pallas_src>

<mosaic_0001>
module attributes {stable_mosaic.version = 11 : i64} {
  func.func @_focal_loss_kernel(%arg0: i32, %arg1: memref<8x4xf32, #tpu.memory_space<vmem>>, %arg2: memref<8x1xi32, #tpu.memory_space<vmem>>, %arg3: memref<1x4xf32, #tpu.memory_space<vmem>>, %arg4: memref<1x1xf32, #tpu.memory_space<vmem>>) attributes {dimension_semantics = [#tpu.dimension_semantics<arbitrary>], iteration_bounds = array<i64: 1>, scalar_prefetch = 0 : i64, scratch_operands = 0 : i64, tpu.core_type = #tpu.core_type<tc>, window_params = [{transform_indices = @transform_0, window_bounds = array<i64: 8, 4>}, {pipeline_mode = #tpu.pipeline_mode<synchronous>, transform_indices = @transform_1, window_bounds = array<i64: 8, 1>}, {transform_indices = @transform_2, window_bounds = array<i64: 1, 4>}, {pipeline_mode = #tpu.pipeline_mode<synchronous>, transform_indices = @transform_3, window_bounds = array<i64: 1, 1>}]} {
    %c0_i32 = arith.constant 0 : i32
    %0 = arith.cmpi eq, %arg0, %c0_i32 : i32
    %1 = arith.extui %0 : i1 to i32
    %c0_i32_0 = arith.constant 0 : i32
    %2 = arith.cmpi ne, %1, %c0_i32_0 : i32
    scf.if %2 {
      %cst_20 = arith.constant 0.000000e+00 : f32
      %51 = vector.broadcast %cst_20 : f32 to vector<1x1xf32>
      %c0_21 = arith.constant 0 : index
      %c0_22 = arith.constant 0 : index
      %52 = vector.load %arg4[%c0_21, %c0_22] : memref<1x1xf32, #tpu.memory_space<vmem>>, vector<1x1xf32>
      tpu.vector_store %arg4[%c0_21, %c0_22], %51 {strides = array<i32>} : memref<1x1xf32, #tpu.memory_space<vmem>>, vector<1x1xf32>,
    } else {
    }
    %c0 = arith.constant 0 : index
    %c0_1 = arith.constant 0 : index
    %3 = vector.load %arg1[%c0, %c0_1] : memref<8x4xf32, #tpu.memory_space<vmem>>, vector<8x4xf32>
    %c0_2 = arith.constant 0 : index
    %c0_3 = arith.constant 0 : index
    %4 = vector.load %arg2[%c0_2, %c0_3] : memref<8x1xi32, #tpu.memory_space<vmem>>, vector<8x1xi32>
    %c0_4 = arith.constant 0 : index
    %c0_5 = arith.constant 0 : index
    %5 = vector.load %arg3[%c0_4, %c0_5] : memref<1x4xf32, #tpu.memory_space<vmem>>, vector<1x4xf32>
    %cst = arith.constant dense<0xFF800000> : vector<4xf32>
    %6 = vector.multi_reduction <maximumf>, %3, %cst [0] : vector<8x4xf32> to vector<4xf32>
    %7 = vector.shape_cast %6 : vector<4xf32> to vector<1x4xf32>
    %8 = vector.broadcast %7 : vector<1x4xf32> to vector<8x4xf32>
    %9 = arith.subf %3, %8 : vector<8x4xf32>
    %10 = math.exp %9 : vector<8x4xf32>
    %cst_6 = arith.constant dense<0.000000e+00> : vector<4xf32>
    %11 = vector.multi_reduction <add>, %10, %cst_6 [0] : vector<8x4xf32> to vector<4xf32>
    %12 = vector.shape_cast %11 : vector<4xf32> to vector<1x4xf32>
    %13 = math.log %12 : vector<1x4xf32>
    %14 = vector.broadcast %13 : vector<1x4xf32> to vector<8x4xf32>
    %15 = arith.subf %9, %14 : vector<8x4xf32>
    %16 = tpu.iota {dimensions = array<i32: 1>} : vector<8x4xi32>
    %c4_i32 = arith.constant 4 : i32
    %17 = arith.muli %arg0, %c4_i32 : i32
    %18 = vector.broadcast %17 : i32 to vector<8x4xi32>
    %19 = arith.addi %16, %18 : vector<8x4xi32>
    %20 = vector.broadcast %4 : vector<8x1xi32> to vector<8x4xi32>
    %21 = arith.cmpi eq, %19, %20 : vector<8x4xi32>
    %cst_7 = arith.constant 0.000000e+00 : f32
    %22 = vector.broadcast %cst_7 : f32 to vector<8x4xf32>
    %23 = arith.select %21, %15, %22 : vector<8x4xi1>, vector<8x4xf32>
    %cst_8 = arith.constant dense<0.000000e+00> : vector<8xf32>
    %24 = vector.multi_reduction <add>, %23, %cst_8 [1] : vector<8x4xf32> to vector<8xf32>
    %25 = vector.shape_cast %24 : vector<8xf32> to vector<8x1xf32>
    %cst_9 = arith.constant 0.000000e+00 : f32
    %26 = vector.shape_cast %5 : vector<1x4xf32> to vector<1x4xf32>
    %27 = vector.broadcast %26 : vector<1x4xf32> to vector<8x4xf32>
    %28 = vector.broadcast %cst_9 : f32 to vector<8x4xf32>
    %29 = arith.select %21, %27, %28 : vector<8x4xi1>, vector<8x4xf32>
    %cst_10 = arith.constant dense<0.000000e+00> : vector<8xf32>
    %30 = vector.multi_reduction <add>, %29, %cst_10 [1] : vector<8x4xf32> to vector<8xf32>
    %31 = vector.shape_cast %30 : vector<8xf32> to vector<8x1xf32>
    %32 = math.exp %25 : vector<8x1xf32>
    %cst_11 = arith.constant 1.000000e+00 : f32
    %33 = vector.broadcast %cst_11 : f32 to vector<8x1xf32>
    %34 = arith.subf %33, %32 : vector<8x1xf32>
    %35 = arith.mulf %34, %34 : vector<8x1xf32>
    %cst_12 = arith.constant 0.000000e+00 : f32
    %36 = vector.broadcast %cst_12 : f32 to vector<8x1xf32>
    %37 = arith.subf %36, %31 : vector<8x1xf32>
    %38 = arith.mulf %37, %35 : vector<8x1xf32>
    %39 = arith.mulf %38, %25 : vector<8x1xf32>
    %c0_13 = arith.constant 0 : index
    %c0_14 = arith.constant 0 : index
    %40 = vector.load %arg4[%c0_13, %c0_14] : memref<1x1xf32, #tpu.memory_space<vmem>>, vector<1x1xf32>
    %41 = vector.shape_cast %39 : vector<8x1xf32> to vector<1x8x1xf32>
    %cst_15 = arith.constant dense<0.000000e+00> : vector<1xf32>
    %42 = vector.multi_reduction <add>, %41, %cst_15 [1, 2] : vector<1x8x1xf32> to vector<1xf32>
    %43 = vector.shape_cast %42 : vector<1xf32> to vector<1x1x1xf32>
    %44 = vector.extract %43[0, 0, 0] : f32 from vector<1x1x1xf32>
    %45 = vector.broadcast %44 : f32 to vector<1x1xf32>
    %46 = arith.addf %40, %45 : vector<1x1xf32>
    %c0_16 = arith.constant 0 : index
    %c0_17 = arith.constant 0 : index
    %47 = vector.load %arg4[%c0_16, %c0_17] : memref<1x1xf32, #tpu.memory_space<vmem>>, vector<1x1xf32>
    tpu.vector_store %arg4[%c0_16, %c0_17], %46 {strides = array<i32>} : memref<1x1xf32, #tpu.memory_space<vmem>>, vector<1x1xf32>,
    %c0_i32_18 = arith.constant 0 : i32
    %48 = arith.cmpi eq, %arg0, %c0_i32_18 : i32
    %49 = arith.extui %48 : i1 to i32
    %c0_i32_19 = arith.constant 0 : i32
    %50 = arith.cmpi ne, %49, %c0_i32_19 : i32
    scf.if %50 {
      %c0_20 = arith.constant 0 : index
      %c0_21 = arith.constant 0 : index
      %51 = vector.load %arg4[%c0_20, %c0_21] : memref<1x1xf32, #tpu.memory_space<vmem>>, vector<1x1xf32>
      %cst_22 = arith.constant 1.250000e-01 : f32
      %52 = vector.broadcast %cst_22 : f32 to vector<1x1xf32>
      %53 = arith.mulf %51, %52 : vector<1x1xf32>
      %c0_23 = arith.constant 0 : index
      %c0_24 = arith.constant 0 : index
      %54 = vector.load %arg4[%c0_23, %c0_24] : memref<1x1xf32, #tpu.memory_space<vmem>>, vector<1x1xf32>
      tpu.vector_store %arg4[%c0_23, %c0_24], %53 {strides = array<i32>} : memref<1x1xf32, #tpu.memory_space<vmem>>, vector<1x1xf32>,
    } else {
    }
    return
  }
  func.func @transform_0(%arg0: i32) -> (i32, i32) {
    %c0_i32 = arith.constant 0 : i32
    %c0_i32_0 = arith.constant 0 : i32
    return %c0_i32, %arg0 : i32, i32
  }
  func.func @transform_1(%arg0: i32) -> (i32, i32) {
    %c0_i32 = arith.constant 0 : i32
    %c0_i32_0 = arith.constant 0 : i32
    %c0_i32_1 = arith.constant 0 : i32
    return %c0_i32, %c0_i32_0 : i32, i32
  }
  func.func @transform_2(%arg0: i32) -> (i32, i32) {
    %c0_i32 = arith.constant 0 : i32
    %c0_i32_0 = arith.constant 0 : i32
    return %c0_i32, %arg0 : i32, i32
  }
  func.func @transform_3(%arg0: i32) -> (i32, i32) {
    %c0_i32 = arith.constant 0 : i32
    %c0_i32_0 = arith.constant 0 : i32
    %c0_i32_1 = arith.constant 0 : i32
    return %c0_i32, %c0_i32_0 : i32, i32
  }
}

</mosaic_0001>

<bundles_post_ra>
// kernel: tpu_custom_call.1
= control target key start
LH: loop header
LB: loop body
LE: loop exit
PB: predicated region body
PF: predicated region fallthrough
CT: control target
= control target key end

     0   :  { %s199_s0 = inlined_call_operand.vmem [shape: f32[8,4], index: 0, kind: input, shape index: {}]   ;;  %s200_s1 = inlined_call_operand.vmem [shape: s32[8,1], index: 1, kind: input, shape index: {}]   ;;  %s201_s2 = inlined_call_operand.vmem [shape: f32[1,4], index: 2, kind: input, shape index: {}]   ;;  %s202_s3 = inlined_call_operand.hbm [shape: f32[1,1], index: 3, kind: output, shape index: {}]  }
   0x1   :  { %v22_v0 = vld [vmem:[%s200_s1] sm:$0xff] }
   0x2   :  { %8 = vsyncpa [#allocation3], 0  ;;  %v148_v1 = vmov 0   ;;  %vm24_vm0 = vcmask 31744   ;;  %v21_v2 = vld [vmem:[%s199_s0] sm:$0xff]  ;;  %v45_v21 = vlaneseq  ;;  %vm76_vm2 = vcmask 7168  }
   0x3   :  { %117 = vset.pattern.permute.xlu0 %v148_v1  ;;  %v25_v3 = vsel %vm24_vm0, %v21_v2, -inf  ;;  %v111_v25 = vld [vmem:[%s201_s2] ss:$0 sm:$0xff]  ;;  %vm19_vm3 = vcmask 0   ;;  %v149_v41 = vmov 0.0   ;;  %s150_s16 = smov [#allocation2]  }
   0x4   :  { %51 = vperm.xlu0 %117, %v22_v0   ;;  %v26_v4 = vrot.slane %v25_v3, 4  ;;  %v46_v23 = vand.u32 127, %v45_v21  ;;  %20 = vst.msk [vmem:[#allocation2] sm:$0x1] %vm19_vm3, %v149_v41  ;;  %s103_s17 = sshll.u32 %s150_s16, 4  ;;  %s104_s17 = int_to_ptr.vmem [resolvable:$true] %s103_s17 }
   0x5   :  { %s124_s18 = scalar_lea.vmem %s104_s17, 16  ;;  %s128_s19 = scalar_lea.vmem %s104_s17, 32 }
   0x6   :  { %v27_v5 = vmax.f32 %v25_v3, %v26_v4  ;;  %p125_p0 = scmp.ne.s32.totalorder %s104_s17, %s124_s18  ;;  %p129_p1 = scmp.lt.s32.totalorder %s104_s17, %s104_s17 }
   0x7   :  { %p130_p2 = scmp.lt.s32.totalorder %s128_s19, %s124_s18 }
   0x8   :  { %v28_v6 = vrot.slane %v27_v5, 2 }
   0x9   :  { %p131_p3 = por %p130_p2, %p129_p1 }
   0xa   :  { %v29_v7 = vmax.f32 %v27_v5, %v28_v6 }
   0xb   :  { %v75_v49 = vld [vmem:[#allocation2] sm:$0x1]  ;;  %p132_p4 = pnand %p131_p3, %p125_p0 }
   0xc   :  { %v30_v8 = vrot.slane %v29_v7, 1 }
   0xe   :  { %v31_v9 = vmax.f32 %v29_v7, %v30_v8 }
  0x10   :  { %v32_v10 = vsub.f32 %v21_v2, %v31_v9 }
  0x12   :  { %v33_v11 = vmul.f32 1.442695, %v32_v10 }
  0x14   :  { %118 = vpow2.f32 %v33_v11 }
  0x1e   :  { %v119_v12 = vpop.eup %118 }
  0x1f   :  { %v35_v13 = vsel %vm24_vm0, %v119_v12, 0.0 }
  0x20   :  { %v36_v14 = vrot.slane %v35_v13, 4 }
  0x22   :  { %v37_v15 = vadd.f32 %v36_v14, %v35_v13 }
  0x24   :  { %v38_v16 = vrot.slane %v37_v15, 2 }
  0x26   :  { %v39_v17 = vadd.f32 %v38_v16, %v37_v15 }
  0x28   :  { %v40_v18 = vrot.slane %v39_v17, 1 }
  0x2a   :  { %v41_v19 = vadd.f32 %v40_v18, %v39_v17 }
  0x2c   :  { %120 = vlog2.f32 %v41_v19 }
  0x36   :  { %v121_v20 = vpop.eup %120 }
  0x37   :  { %v43_v22 = vmul.f32 0.6931472, %v121_v20 }
  0x39   :  { %v44_v24 = vsub.f32 %v32_v10, %v43_v22 }
  0x83   :  { %v52_v26 = vpop.permute.xlu0 %51 }
  0x84   :  { %vm53_vm1 = vcmp.eq.s32.totalorder %v46_v23, %v52_v26 }
  0x85   :  { %v64_v27 = vsel %vm53_vm1, %v111_v25, 0.0  ;;  %v54_v28 = vsel %vm53_vm1, %v44_v24, 0.0 }
  0x86   :  { %v65_v29 = vsel %vm24_vm0, %v64_v27, 0.0  ;;  %v55_v30 = vsel %vm24_vm0, %v54_v28, 0.0 }
  0x87   :  { %66 = vadd.xlane.f32.xlu1 %v65_v29  ;;  %56 = vadd.xlane.f32.xlu0 %v55_v30 }
 0x114   :  { %v57_v31 = vpop.xlane.xlu0 %56  ;;  %v67_v34 = vpop.xlane.xlu1 %66 }
 0x115   :  { %v68_v32 = vmul.f32 1.442695, %v57_v31  ;;  %v72_v36 = vsub.f32 0.0, %v67_v34 }
 0x117   :  { %122 = vpow2.f32 %v68_v32 }
 0x121   :  { %v123_v33 = vpop.eup %122 }
 0x122   :  { %v70_v35 = vsub.f32 1.0, %v123_v33 }
 0x124   :  { %v71_v37 = vmul.f32 %v70_v35, %v70_v35 }
 0x126   :  { %v73_v38 = vmul.f32 %v72_v36, %v71_v37 }
 0x128   :  { %v74_v39 = vmul.f32 %v73_v38, %v57_v31 }
 0x12a   :  { %v77_v40 = vsel %vm76_vm2, %v74_v39, 0.0 }
 0x12b   :  { %78 = vadd.xlane.f32.xlu1 %v77_v40 }
 0x1b8   :  { %v79_v42 = vpop.xlane.xlu1 %78 }
 0x1b9   :  { %v80_v43 = vrot.slane %v79_v42, 4 }
 0x1bb   :  { %v81_v44 = vadd.f32 %v80_v43, %v79_v42 }
 0x1bd   :  { %v82_v45 = vrot.slane %v81_v44, 2 }
 0x1bf   :  { %v83_v46 = vadd.f32 %v82_v45, %v81_v44 }
 0x1c1   :  { %v84_v47 = vrot.slane %v83_v46, 1 }
 0x1c3   :  { %v85_v48 = vadd.f32 %v84_v47, %v83_v46 }
 0x1c5   :  { %112 = vpush %v85_v48 }
 0x1f6   :  { %s113_s2 = spop %112 }
 0x1f7   :  { %v87_v50 = vstv %s113_s2 }
 0x1f8   :  { %v88_v51 = vadd.f32 %v87_v50, %v75_v49 }
 0x1fa   :  { %90 = vst.msk [vmem:[#allocation2] sm:$0x1] %vm19_vm3, %v88_v51 }
 0x201   :  { %v94_v52 = vld [vmem:[#allocation2] sm:$0x1] }
 0x202   :  { %v95_v53 = vmul.f32 0.125, %v94_v52 }
 0x204   :  { %96 = vst.msk [vmem:[#allocation2] sm:$0x1] %vm19_vm3, %v95_v53 }
 0x205   :  { %135 = shalt.err (!%p132_p4)
}
 0x206   :  { %s136_s22 = scalar_lea.hbm %s202_s3, 16 }
 0x207   :  { %p137_p5 = scmp.ne.s32.totalorder %s202_s3, %s136_s22  ;;  %p140_p6 = scmp.lt.u32.totalorder %s136_s22, %s202_s3 }
 0x209   :  { %p142_p7 = pnand %p140_p6, %p137_p5 }
 0x20b   :  { %145 = shalt.err (!%p142_p7)
}
 0x20c   :  { %106 = dma.vmem_to_hbm [thread:$0]  %s104_s17, 16, %s202_s3, [#allocation3]  }
 0x20d   :  { %146 = dma.done.wait [#allocation3], 16  }
 0x20e   :  { %147 = vsyncadd [#allocation3], 4294967280 }
 0x20f   :  { %110 = vsyncpa [#allocation3], 1 }

</bundles_post_ra>
